<compile_context>
chip_gen: v7x
topology: tpu7x:2x2x1
jax: 0.10.0
libtpu: 0.0.40
codegen_flags: <defaults>
</compile_context>

<pallas_src>
import math

import jax
import jax.numpy as jnp
from jax.experimental import pallas as pl
from jax.experimental.pallas import tpu as pltpu


# ---------------------------------------------------------------------------
# Fused kernel
# ---------------------------------------------------------------------------
def _make_fused_fan_kernel(num_fan_layers, input_dim, output_dim):
    """Kernel: x, emb_w, emb_b, (fanW, fanB)*L, head_w, head_b -> out."""

    def kernel(*refs):
        x_ref = refs[0]
        emb_w_ref, emb_b_ref = refs[1], refs[2]
        fan_refs = refs[3:3 + 2 * num_fan_layers]
        head_w_ref = refs[3 + 2 * num_fan_layers]
        head_b_ref = refs[4 + 2 * num_fan_layers]
        o_ref = refs[5 + 2 * num_fan_layers]

        x = x_ref[...].astype(jnp.float32)

        # ---- embedding: Linear(input_dim -> H) ----
        if input_dim == 1:
            # K=1 matmul == outer product: do it on the VPU (broadcast mul).
            h = x * emb_w_ref[...] + emb_b_ref[...]
        else:
            h = (
                jnp.dot(x, emb_w_ref[...], preferred_element_type=jnp.float32)
                + emb_b_ref[...]
            )

        hidden = h.shape[-1]
        p_dim = hidden // 4
        # (1, hidden) lane mask, built once; jnp.where broadcasts it over rows.
        lane = jax.lax.broadcasted_iota(jnp.int32, (1, hidden), 1)
        trig_mask = lane < 2 * p_dim
        inv_sqrt2 = 1.0 / math.sqrt(2.0)

        # ---- FAN layers: one 128-wide matmul + per-lane nonlinearity ----
        # Bias is pre-packed as [bp + pi/2, bp, bg], so sin() on the first
        # 2*p_dim lanes yields [cos(p), sin(p)] and GELU covers the rest.
        for l in range(num_fan_layers):
            w = fan_refs[2 * l][...]
            b = fan_refs[2 * l + 1][...]
            pre = jnp.dot(h, w, preferred_element_type=jnp.float32) + b
            sin_v = jnp.sin(pre)
            # exact (erf-based) GELU, matching torch.nn.GELU() default
            gelu_v = 0.5 * pre * (1.0 + jax.lax.erf(pre * inv_sqrt2))
            h = jnp.where(trig_mask, sin_v, gelu_v)

        # ---- head: Linear(H -> output_dim); matmul over padded N, store the
        #      first output_dim lanes only (unpadded HBM output) ----
        y = (
            jnp.dot(h, head_w_ref[...], preferred_element_type=jnp.float32)
            + head_b_ref[...]
        )
        o_ref[...] = y[:, :output_dim].astype(o_ref.dtype)

    return kernel


# ---------------------------------------------------------------------------
# Wrapper
# ---------------------------------------------------------------------------
def _round_up(a, b):
    return ((a + b - 1) // b) * b


def fan_forward_pallas(params, src):
    batch, input_dim = src.shape
    hidden = params["emb_w"].shape[1]
    output_dim = params["head_w"].shape[1]
    num_fan_layers = len(params["fan_layers"])
    w_dtype = params["head_w"].dtype
    out_dtype = jnp.result_type(src.dtype, w_dtype)

    # --- pre-pack weights (done once per call; XLA fuses/caches under jit) ---
    emb_w = params["emb_w"]                      # (input_dim, H)
    emb_b = params["emb_b"].reshape(1, hidden)   # (1, H)

    half_pi = math.pi / 2.0
    fan_packed = []
    for (wp, bp, wg, bg) in params["fan_layers"]:
        # W = [Wp | Wp | Wg]; bias = [bp + pi/2, bp, bg]  (cos(x) == sin(x+pi/2))
        w_packed = jnp.concatenate([wp, wp, wg], axis=1)                      # (H, H)
        b_packed = jnp.concatenate([bp + half_pi, bp, bg]).reshape(1, hidden)  # (1, H)
        fan_packed.append((w_packed, b_packed))

    # Head weights lane-padded (for an efficient MXU matmul); padded buffers
    # keep the parameter dtype to avoid silent downcasts.
    n_pad = _round_up(max(output_dim, 1), 128)
    head_w = jnp.zeros((hidden, n_pad), w_dtype).at[:, :output_dim].set(
        params["head_w"]
    )
    head_b = jnp.zeros((1, n_pad), w_dtype).at[0, :output_dim].set(params["head_b"])

    # --- row tiling ---
    # batch >= 16: guarantee >= 2 grid steps so both TensorCores run on v7x;
    # cap the tile at 1024 rows (amortizes ~0.35us/step, still tiny in VMEM).
    m8 = _round_up(batch, 8)
    if batch >= 16:
        tile_m = min(1024, _round_up((m8 + 1) // 2, 8))
    else:
        tile_m = m8
    m_pad = _round_up(m8, tile_m)
    if m_pad != batch:
        x = jnp.zeros((m_pad, input_dim), src.dtype).at[:batch].set(src)
    else:
        x = src
    grid = (m_pad // tile_m,)

    # --- block specs ---
    def resident(shape):
        # full-block weight/bias, resident across the row grid
        return pl.BlockSpec(shape, lambda i, _s=shape: tuple(0 for _ in _s))

    in_specs = [pl.BlockSpec((tile_m, input_dim), lambda i: (i, 0))]  # x (row-tiled)
    in_specs += [resident(emb_w.shape), resident(emb_b.shape)]
    inputs = [x, emb_w, emb_b]
    for (w_packed, b_packed) in fan_packed:
        in_specs += [resident(w_packed.shape), resident(b_packed.shape)]
        inputs += [w_packed, b_packed]
    in_specs += [resident(head_w.shape), resident(head_b.shape)]
    inputs += [head_w, head_b]

    # Unpadded output block: last dim equals full array dim (allowed), so no
    # padded HBM buffer and no post-kernel column slice.
    out_spec = pl.BlockSpec((tile_m, output_dim), lambda i: (i, 0))

    kernel = _make_fused_fan_kernel(num_fan_layers, input_dim, output_dim)
    out_full = pl.pallas_call(
        kernel,
        out_shape=jax.ShapeDtypeStruct((m_pad, output_dim), out_dtype),
        grid=grid,
        in_specs=in_specs,
        out_specs=out_spec,
        compiler_params=pltpu.CompilerParams(
            dimension_semantics=("parallel",)
        ),
    )(*inputs)

    return out_full[:batch] if m_pad != batch else out_full


# ---------------------------------------------------------------------------
# FAN model: deterministic parameter init + pure-JAX reference
# ---------------------------------------------------------------------------
def init_fan_params(key, input_dim, output_dim, hidden_dim, num_layers):
    """Weights stored as (in, out); biases as (out,)."""
    def linear_init(k, fan_in, fan_out):
        kw, kb = jax.random.split(k)
        bound = 1.0 / math.sqrt(fan_in)
        w = jax.random.uniform(kw, (fan_in, fan_out), jnp.float32, -bound, bound)
        b = jax.random.uniform(kb, (fan_out,), jnp.float32, -bound, bound)
        return w, b

    keys = jax.random.split(key, 2 * num_layers)
    params = {}
    params["emb_w"], params["emb_b"] = linear_init(keys[0], input_dim, hidden_dim)
    fan_layers = []
    for i in range(num_layers - 1):
        kp, kg = jax.random.split(keys[1 + i])
        wp, bp = linear_init(kp, hidden_dim, hidden_dim // 4)
        wg, bg = linear_init(kg, hidden_dim, hidden_dim - hidden_dim // 2)
        fan_layers.append((wp, bp, wg, bg))
    params["fan_layers"] = fan_layers
    params["head_w"], params["head_b"] = linear_init(
        keys[num_layers], hidden_dim, output_dim
    )
    return params


def fan_forward_ref(params, src):
    """Pure-JAX reference mirroring the PyTorch forward."""
    x = src @ params["emb_w"] + params["emb_b"]
    for (wp, bp, wg, bg) in params["fan_layers"]:
        p = x @ wp + bp
        h = x @ wg + bg
        g = 0.5 * h * (1.0 + jax.lax.erf(h / math.sqrt(2.0)))
        x = jnp.concatenate([jnp.cos(p), jnp.sin(p), g], axis=-1)
    return x @ params["head_w"] + params["head_b"]


if __name__ == "__main__":
    # Small shapes consistent with the module: FAN(input_dim=1, output_dim=1,
    # hidden_dim=128, num_layers=3); src is (batch, input_dim).
    input_dim, output_dim, hidden_dim, num_layers = 1, 1, 128, 3

    key = jax.random.PRNGKey(0)
    k_param, k_src = jax.random.split(key)
    params = init_fan_params(k_param, input_dim, output_dim, hidden_dim, num_layers)

    # Case 1: tiny batch (single grid step).
    src = jax.random.normal(k_src, (8, input_dim), jnp.float32)
    out = jax.block_until_ready(fan_forward_pallas(params, src))
    ref = jax.block_until_ready(fan_forward_ref(params, src))
    assert out.shape == (8, output_dim), out.shape
    assert jnp.allclose(out, ref, rtol=1e-5, atol=1e-5), (out, ref)

    # Case 2: batch that exercises row padding + >=2 grid steps (megacore path).
    src2 = jax.random.normal(jax.random.fold_in(k_src, 1), (40, input_dim), jnp.float32)
    out2 = jax.block_until_ready(fan_forward_pallas(params, src2))
    ref2 = jax.block_until_ready(fan_forward_ref(params, src2))
    assert out2.shape == (40, output_dim), out2.shape
    assert jnp.allclose(out2, ref2, rtol=1e-5, atol=1e-5), (out2, ref2)

    print("KERNEL_OK")
</pallas_src>

<mosaic_0001>
module attributes {stable_mosaic.version = 11 : i64} {
  func.func @kernel(%arg0: i32, %arg1: memref<8x1xf32, #tpu.memory_space<vmem>>, %arg2: memref<1x128xf32, #tpu.memory_space<vmem>>, %arg3: memref<1x128xf32, #tpu.memory_space<vmem>>, %arg4: memref<128x128xf32, #tpu.memory_space<vmem>>, %arg5: memref<1x128xf32, #tpu.memory_space<vmem>>, %arg6: memref<128x128xf32, #tpu.memory_space<vmem>>, %arg7: memref<1x128xf32, #tpu.memory_space<vmem>>, %arg8: memref<128x128xf32, #tpu.memory_space<vmem>>, %arg9: memref<1x128xf32, #tpu.memory_space<vmem>>, %arg10: memref<8x1xf32, #tpu.memory_space<vmem>>) attributes {dimension_semantics = [#tpu.dimension_semantics<parallel>], iteration_bounds = array<i64: 1>, scalar_prefetch = 0 : i64, scratch_operands = 0 : i64, tpu.core_type = #tpu.core_type<tc>, window_params = [{transform_indices = @transform_0, window_bounds = array<i64: 8, 1>}, {pipeline_mode = #tpu.pipeline_mode<synchronous>, transform_indices = @transform_1, window_bounds = array<i64: 1, 128>}, {pipeline_mode = #tpu.pipeline_mode<synchronous>, transform_indices = @transform_2, window_bounds = array<i64: 1, 128>}, {pipeline_mode = #tpu.pipeline_mode<synchronous>, transform_indices = @transform_3, window_bounds = array<i64: 128, 128>}, {pipeline_mode = #tpu.pipeline_mode<synchronous>, transform_indices = @transform_4, window_bounds = array<i64: 1, 128>}, {pipeline_mode = #tpu.pipeline_mode<synchronous>, transform_indices = @transform_5, window_bounds = array<i64: 128, 128>}, {pipeline_mode = #tpu.pipeline_mode<synchronous>, transform_indices = @transform_6, window_bounds = array<i64: 1, 128>}, {pipeline_mode = #tpu.pipeline_mode<synchronous>, transform_indices = @transform_7, window_bounds = array<i64: 128, 128>}, {pipeline_mode = #tpu.pipeline_mode<synchronous>, transform_indices = @transform_8, window_bounds = array<i64: 1, 128>}, {transform_indices = @transform_9, window_bounds = array<i64: 8, 1>}]} {
    %c0 = arith.constant 0 : index
    %c0_0 = arith.constant 0 : index
    %0 = vector.load %arg1[%c0, %c0_0] : memref<8x1xf32, #tpu.memory_space<vmem>>, vector<8x1xf32>
    %c0_1 = arith.constant 0 : index
    %c0_2 = arith.constant 0 : index
    %1 = vector.load %arg2[%c0_1, %c0_2] : memref<1x128xf32, #tpu.memory_space<vmem>>, vector<1x128xf32>
    %2 = vector.broadcast %0 : vector<8x1xf32> to vector<8x128xf32>
    %3 = vector.broadcast %1 : vector<1x128xf32> to vector<8x128xf32>
    %4 = arith.mulf %2, %3 : vector<8x128xf32>
    %c0_3 = arith.constant 0 : index
    %c0_4 = arith.constant 0 : index
    %5 = vector.load %arg3[%c0_3, %c0_4] : memref<1x128xf32, #tpu.memory_space<vmem>>, vector<1x128xf32>
    %6 = vector.broadcast %5 : vector<1x128xf32> to vector<8x128xf32>
    %7 = arith.addf %4, %6 : vector<8x128xf32>
    %8 = tpu.iota {dimensions = array<i32: 1>} : vector<1x128xi32>
    %c64_i32 = arith.constant 64 : i32
    %9 = vector.broadcast %c64_i32 : i32 to vector<1x128xi32>
    %10 = arith.cmpi slt, %8, %9 : vector<1x128xi32>
    %c0_5 = arith.constant 0 : index
    %c0_6 = arith.constant 0 : index
    %11 = vector.load %arg4[%c0_5, %c0_6] : memref<128x128xf32, #tpu.memory_space<vmem>>, vector<128x128xf32>
    %c0_7 = arith.constant 0 : index
    %c0_8 = arith.constant 0 : index
    %12 = vector.load %arg5[%c0_7, %c0_8] : memref<1x128xf32, #tpu.memory_space<vmem>>, vector<1x128xf32>
    %cst = arith.constant dense<0.000000e+00> : vector<8x128xf32>
    %13 = tpu.matmul %7, %11, %cst {dimension_numbers = #tpu.dot_dimension_numbers<[1], [0], [0], [1], [0, 0, 1, 1], [], []>} : vector<8x128xf32>, vector<128x128xf32>, vector<8x128xf32> -> vector<8x128xf32>
    %14 = vector.broadcast %12 : vector<1x128xf32> to vector<8x128xf32>
    %15 = arith.addf %13, %14 : vector<8x128xf32>
    %16 = math.sin %15 : vector<8x128xf32>
    %cst_9 = arith.constant 5.000000e-01 : f32
    %17 = vector.broadcast %cst_9 : f32 to vector<8x128xf32>
    %18 = arith.mulf %17, %15 : vector<8x128xf32>
    %cst_10 = arith.constant 0.707106769 : f32
    %19 = vector.broadcast %cst_10 : f32 to vector<8x128xf32>
    %20 = arith.mulf %15, %19 : vector<8x128xf32>
    %21 = math.erf %20 : vector<8x128xf32>
    %cst_11 = arith.constant 1.000000e+00 : f32
    %22 = vector.broadcast %cst_11 : f32 to vector<8x128xf32>
    %23 = arith.addf %22, %21 : vector<8x128xf32>
    %24 = arith.mulf %18, %23 : vector<8x128xf32>
    %25 = vector.shape_cast %10 : vector<1x128xi1> to vector<1x128xi1>
    %26 = vector.broadcast %25 : vector<1x128xi1> to vector<8x128xi1>
    %27 = arith.select %26, %16, %24 : vector<8x128xi1>, vector<8x128xf32>
    %c0_12 = arith.constant 0 : index
    %c0_13 = arith.constant 0 : index
    %28 = vector.load %arg6[%c0_12, %c0_13] : memref<128x128xf32, #tpu.memory_space<vmem>>, vector<128x128xf32>
    %c0_14 = arith.constant 0 : index
    %c0_15 = arith.constant 0 : index
    %29 = vector.load %arg7[%c0_14, %c0_15] : memref<1x128xf32, #tpu.memory_space<vmem>>, vector<1x128xf32>
    %cst_16 = arith.constant dense<0.000000e+00> : vector<8x128xf32>
    %30 = tpu.matmul %27, %28, %cst_16 {dimension_numbers = #tpu.dot_dimension_numbers<[1], [0], [0], [1], [0, 0, 1, 1], [], []>} : vector<8x128xf32>, vector<128x128xf32>, vector<8x128xf32> -> vector<8x128xf32>
    %31 = vector.broadcast %29 : vector<1x128xf32> to vector<8x128xf32>
    %32 = arith.addf %30, %31 : vector<8x128xf32>
    %33 = math.sin %32 : vector<8x128xf32>
    %cst_17 = arith.constant 5.000000e-01 : f32
    %34 = vector.broadcast %cst_17 : f32 to vector<8x128xf32>
    %35 = arith.mulf %34, %32 : vector<8x128xf32>
    %cst_18 = arith.constant 0.707106769 : f32
    %36 = vector.broadcast %cst_18 : f32 to vector<8x128xf32>
    %37 = arith.mulf %32, %36 : vector<8x128xf32>
    %38 = math.erf %37 : vector<8x128xf32>
    %cst_19 = arith.constant 1.000000e+00 : f32
    %39 = vector.broadcast %cst_19 : f32 to vector<8x128xf32>
    %40 = arith.addf %39, %38 : vector<8x128xf32>
    %41 = arith.mulf %35, %40 : vector<8x128xf32>
    %42 = vector.shape_cast %10 : vector<1x128xi1> to vector<1x128xi1>
    %43 = vector.broadcast %42 : vector<1x128xi1> to vector<8x128xi1>
    %44 = arith.select %43, %33, %41 : vector<8x128xi1>, vector<8x128xf32>
    %c0_20 = arith.constant 0 : index
    %c0_21 = arith.constant 0 : index
    %45 = vector.load %arg8[%c0_20, %c0_21] : memref<128x128xf32, #tpu.memory_space<vmem>>, vector<128x128xf32>
    %cst_22 = arith.constant dense<0.000000e+00> : vector<8x128xf32>
    %46 = tpu.matmul %44, %45, %cst_22 {dimension_numbers = #tpu.dot_dimension_numbers<[1], [0], [0], [1], [0, 0, 1, 1], [], []>} : vector<8x128xf32>, vector<128x128xf32>, vector<8x128xf32> -> vector<8x128xf32>
    %c0_23 = arith.constant 0 : index
    %c0_24 = arith.constant 0 : index
    %47 = vector.load %arg9[%c0_23, %c0_24] : memref<1x128xf32, #tpu.memory_space<vmem>>, vector<1x128xf32>
    %48 = vector.broadcast %47 : vector<1x128xf32> to vector<8x128xf32>
    %49 = arith.addf %46, %48 : vector<8x128xf32>
    %50 = vector.extract_strided_slice %49 {offsets = [0, 0], sizes = [8, 1], strides = [1, 1]} : vector<8x128xf32> to vector<8x1xf32>
    %c0_25 = arith.constant 0 : index
    %c0_26 = arith.constant 0 : index
    %51 = vector.load %arg10[%c0_25, %c0_26] : memref<8x1xf32, #tpu.memory_space<vmem>>, vector<8x1xf32>
    tpu.vector_store %arg10[%c0_25, %c0_26], %50 {strides = array<i32>} : memref<8x1xf32, #tpu.memory_space<vmem>>, vector<8x1xf32>,
    return
  }
  func.func @transform_0(%arg0: i32) -> (i32, i32) {
    %c0_i32 = arith.constant 0 : i32
    %c0_i32_0 = arith.constant 0 : i32
    return %arg0, %c0_i32 : i32, i32
  }
  func.func @transform_1(%arg0: i32) -> (i32, i32) {
    %c0_i32 = arith.constant 0 : i32
    %c0_i32_0 = arith.constant 0 : i32
    %c0_i32_1 = arith.constant 0 : i32
    return %c0_i32, %c0_i32_0 : i32, i32
  }
  func.func @transform_2(%arg0: i32) -> (i32, i32) {
    %c0_i32 = arith.constant 0 : i32
    %c0_i32_0 = arith.constant 0 : i32
    %c0_i32_1 = arith.constant 0 : i32
    return %c0_i32, %c0_i32_0 : i32, i32
  }
  func.func @transform_3(%arg0: i32) -> (i32, i32) {
    %c0_i32 = arith.constant 0 : i32
    %c0_i32_0 = arith.constant 0 : i32
    %c0_i32_1 = arith.constant 0 : i32
    return %c0_i32, %c0_i32_0 : i32, i32
  }
  func.func @transform_4(%arg0: i32) -> (i32, i32) {
    %c0_i32 = arith.constant 0 : i32
    %c0_i32_0 = arith.constant 0 : i32
    %c0_i32_1 = arith.constant 0 : i32
    return %c0_i32, %c0_i32_0 : i32, i32
  }
  func.func @transform_5(%arg0: i32) -> (i32, i32) {
    %c0_i32 = arith.constant 0 : i32
    %c0_i32_0 = arith.constant 0 : i32
    %c0_i32_1 = arith.constant 0 : i32
    return %c0_i32, %c0_i32_0 : i32, i32
  }
  func.func @transform_6(%arg0: i32) -> (i32, i32) {
    %c0_i32 = arith.constant 0 : i32
    %c0_i32_0 = arith.constant 0 : i32
    %c0_i32_1 = arith.constant 0 : i32
    return %c0_i32, %c0_i32_0 : i32, i32
  }
  func.func @transform_7(%arg0: i32) -> (i32, i32) {
    %c0_i32 = arith.constant 0 : i32
    %c0_i32_0 = arith.constant 0 : i32
    %c0_i32_1 = arith.constant 0 : i32
    return %c0_i32, %c0_i32_0 : i32, i32
  }
  func.func @transform_8(%arg0: i32) -> (i32, i32) {
    %c0_i32 = arith.constant 0 : i32
    %c0_i32_0 = arith.constant 0 : i32
    %c0_i32_1 = arith.constant 0 : i32
    return %c0_i32, %c0_i32_0 : i32, i32
  }
  func.func @transform_9(%arg0: i32) -> (i32, i32) {
    %c0_i32 = arith.constant 0 : i32
    %c0_i32_0 = arith.constant 0 : i32
    return %arg0, %c0_i32 : i32, i32
  }
}

</mosaic_0001>

<bundles_post_ra>
// kernel: tpu_custom_call.1
= control target key start
LH: loop header
LB: loop body
LE: loop exit
PB: predicated region body
PF: predicated region fallthrough
CT: control target
= control target key end

     0   :  { %14 = vsyncpa [#allocation3], 0  ;;  %s1194_s0 = inlined_call_operand.vmem [shape: f32[8,1], index: 0, kind: input, shape index: {}]   ;;  %s1195_s1 = inlined_call_operand.vmem [shape: f32[1,128], index: 1, kind: input, shape index: {}]   ;;  %s1196_s2 = inlined_call_operand.vmem [shape: f32[1,128], index: 2, kind: input, shape index: {}]   ;;  %s1197_s3 = inlined_call_operand.hbm [shape: f32[128,128], index: 3, kind: input, shape index: {}]   ;;  %s1198_s4 = inlined_call_operand.vmem [shape: f32[1,128], index: 4, kind: input, shape index: {}]   ;;  %s1199_s5 = inlined_call_operand.hbm [shape: f32[128,128], index: 5, kind: input, shape index: {}]   ;;  %s1200_s6 = inlined_call_operand.vmem [shape: f32[1,128], index: 6, kind: input, shape index: {}]   ;;  %s1201_s7 = inlined_call_operand.hbm [shape: f32[128,128], index: 7, kind: input, shape index: {}]   ;;  %s1202_s8 = inlined_call_operand.vmem [shape: f32[1,128], index: 8, kind: input, shape index: {}]   ;;  %s1203_s9 = inlined_call_operand.vmem [shape: f32[8,1], index: 9, kind: output, shape index: {}]  }
   0x1   :  { %15 = vsyncpa [#allocation5], 0  ;;  %s954_s30 = smov [#allocation4]   ;;  %s955_s11 = smov [#allocation2]  }
   0x2   :  { %s41_s10 = sshll.u32 %s954_s30, 4  ;;  %s27_s12 = sshll.u32 %s955_s11, 4  ;;  %s42_s10 = int_to_ptr.vmem [resolvable:$true] %s41_s10  ;;  %s1019_s12 = int_to_ptr.vmem [resolvable:$true] %s27_s12 }
   0x3   :  { %s884_s15 = scalar_lea.hbm %s1199_s5, 2048 }
   0x4   :  { %p885_p0 = scmp.ne.s32.totalorder %s1199_s5, %s884_s15  ;;  %p888_p1 = scmp.lt.u32.totalorder %s884_s15, %s1199_s5 }
   0x6   :  { %p890_p2 = pnand %p888_p1, %p885_p0 }
   0x8   :  { %893 = shalt.err (!%p890_p2)
}
   0x9   :  { %s894_s20 = scalar_lea.vmem %s42_s10, 2048  ;;  %p899_p4 = scmp.lt.s32.totalorder %s42_s10, %s42_s10 }
   0xa   :  { %p895_p3 = scmp.ne.s32.totalorder %s42_s10, %s894_s20  ;;  %p900_p5 = scmp.lt.s32.totalorder %s894_s20, %s894_s20 }
   0xc   :  { %p901_p6 = por %p900_p5, %p899_p4 }
   0xe   :  { %p902_p7 = pnand %p901_p6, %p895_p3 }
  0x10   :  { %905 = shalt.err (!%p902_p7)
}
  0x11   :  { %s956_s21 = smov 128   ;;  %s957_s22 = smov 8  }
  0x12   :  { %47 = dma.hbm_to_vmem [thread:$0]  %s1199_s5, 2048, %s42_s10, [#allocation5], %s956_s21, %s956_s21, %s957_s22  }
  0x13   :  { %s906_s27 = scalar_lea.hbm %s1197_s3, 2048 }
  0x14   :  { %p907_p8 = scmp.ne.s32.totalorder %s1197_s3, %s906_s27  ;;  %p910_p9 = scmp.lt.u32.totalorder %s906_s27, %s1197_s3 }
  0x16   :  { %p912_p10 = pnand %p910_p9, %p907_p8 }
  0x18   :  { %915 = shalt.err (!%p912_p10)
}
  0x19   :  { %s916_s13 = scalar_lea.vmem %s1019_s12, 2048  ;;  %p921_p12 = scmp.lt.s32.totalorder %s1019_s12, %s1019_s12 }
  0x1a   :  { %p917_p11 = scmp.ne.s32.totalorder %s1019_s12, %s916_s13  ;;  %p922_p13 = scmp.lt.s32.totalorder %s916_s13, %s916_s13 }
  0x1c   :  { %p923_p0 = por %p922_p13, %p921_p12 }
  0x1e   :  { %p924_p1 = pnand %p923_p0, %p917_p11 }
  0x20   :  { %927 = shalt.err (!%p924_p1)
}
  0x21   :  { %33 = dma.hbm_to_vmem [thread:$0]  %s1197_s3, 2048, %s1019_s12, [#allocation3], %s956_s21, %s956_s21, %s957_s22  }
  0x22   :  { %s958_s14 = smov [#allocation6]   ;;  %s928_s18 = scalar_lea.hbm %s1201_s7, 2048 }
  0x23   :  { %s55_s15 = sshll.u32 %s958_s14, 4  ;;  %p929_p2 = scmp.ne.s32.totalorder %s1201_s7, %s928_s18  ;;  %s56_s15 = int_to_ptr.vmem [resolvable:$true] %s55_s15 }
  0x24   :  { %p932_p3 = scmp.lt.u32.totalorder %s928_s18, %s1201_s7 }
  0x26   :  { %p934_p4 = pnand %p932_p3, %p929_p2 }
  0x28   :  { %937 = shalt.err (!%p934_p4)
}
  0x29   :  { %s938_s25 = scalar_lea.vmem %s56_s15, 2048  ;;  %p943_p6 = scmp.lt.s32.totalorder %s56_s15, %s56_s15 }
  0x2a   :  { %p939_p5 = scmp.ne.s32.totalorder %s56_s15, %s938_s25  ;;  %p944_p7 = scmp.lt.s32.totalorder %s938_s25, %s938_s25 }
  0x2c   :  { %p945_p8 = por %p944_p7, %p943_p6 }
  0x2e   :  { %p946_p9 = pnand %p945_p8, %p939_p5 }
  0x30   :  { %949 = shalt.err (!%p946_p9)
}
  0x31   :  { %61 = dma.hbm_to_vmem [thread:$0]  %s1201_s7, 2048, %s56_s15, [#allocation5], %s956_s21, %s956_s21, %s957_s22  }
  0x32   :  { %950 = dma.done.wait [#allocation3], 2048  }
  0x33   :  { %951 = vsyncadd [#allocation3], 4294965248 }
  0x34   :  { %952 = dma.done.wait [#allocation5], 4096  }
  0x35   :  { %953 = vsyncadd [#allocation5], 4294963200  ;;  %v959_v0 = vmov 0   ;;  %v960_v1 = vmov 0.0|0.0   ;;  %v73_v2 = vld [vmem:[%s1194_s0] sm:$0xff]  ;;  %v99_v4 = vld [vmem:[#allocation2 + $0x8] sm:$0xff] }
  0x36   :  { %871 = vset.pattern.permute.xlu0 %v959_v0  ;;  %776 = vmatprep.subr.bf16.mxu0 %v960_v1  ;;  %v98_v3 = vld [vmem:[#allocation2] sm:$0xff]  ;;  %v100_v6 = vld [vmem:[#allocation2 + $0x10] sm:$0xff]  ;;  %v101_v7 = vld [vmem:[#allocation2 + $0x18] sm:$0xff]  ;;  %vm961_vm0 = vmmov 0   ;;  %v962_v11 = vmov 0.0  }
  0x37   :  { %800 = vmatprep.subr.bf16.mxu1 %v960_v1  ;;  %77 = vperm.xlu0 %871, %v73_v2   ;;  %v777_v5 = vpack.c.bf16 %v99_v4, %v98_v3  ;;  %v780_v8 = vpack.c.bf16 %v101_v7, %v100_v6  ;;  %v102_v9 = vld [vmem:[#allocation2 + $0x20] sm:$0xff]  ;;  %v103_v10 = vld [vmem:[#allocation2 + $0x28] sm:$0xff]  ;;  %v104_v13 = vld [vmem:[#allocation2 + $0x30] sm:$0xff] }
  0x38   :  { %703 = vmatprep.mubr.msk.f32.mxu0 %vm961_vm0, %v962_v11  ;;  %738 = vmatprep.mubr.msk.f32.mxu1 %vm961_vm0, %v962_v11  ;;  %v783_v12 = vpack.c.bf16 %v103_v10, %v102_v9  ;;  %v105_v14 = vld [vmem:[#allocation2 + $0x38] sm:$0xff]  ;;  %v106_v16 = vld [vmem:[#allocation2 + $0x40] sm:$0xff]  ;;  %v107_v17 = vld [vmem:[#allocation2 + $0x48] sm:$0xff]  ;;  %v964_v10 = vmov 2475754826  }
  0x39   :  { %778 = vmatpush3.bf16.msra.mxu0 %v777_v5  ;;  %v786_v15 = vpack.c.bf16 %v105_v14, %v104_v13  ;;  %v789_v18 = vpack.c.bf16 %v107_v17, %v106_v16  ;;  %v108_v19 = vld [vmem:[#allocation2 + $0x50] sm:$0xff]  ;;  %v109_v20 = vld [vmem:[#allocation2 + $0x58] sm:$0xff]  ;;  %v110_v22 = vld [vmem:[#allocation2 + $0x60] sm:$0xff]  ;;  %v965_v13 = vmov 2131351028  }
  0x3a   :  { %779 = vmatprep.subr.bf16.mxu0 %v960_v1  ;;  %v792_v21 = vpack.c.bf16 %v109_v20, %v108_v19  ;;  %v111_v23 = vld [vmem:[#allocation2 + $0x68] sm:$0xff]  ;;  %v112_v25 = vld [vmem:[#allocation2 + $0x70] sm:$0xff]  ;;  %v113_v26 = vld [vmem:[#allocation2 + $0x78] sm:$0xff]  ;;  %v966_v16 = vmov 2102212464  }
  0x3b   :  { %v795_v24 = vpack.c.bf16 %v111_v23, %v110_v22  ;;  %v798_v27 = vpack.c.bf16 %v113_v26, %v112_v25  ;;  %v607_v28 = vld [vmem:[%s1195_s1] ss:$0 sm:$0xff]  ;;  %v304_v34 = vld [vmem:[#allocation4 + $0x8] sm:$0xff]  ;;  %v305_v35 = vld [vmem:[#allocation4 + $0x10] sm:$0xff]  ;;  %v967_v19 = vmov 920167782  }
  0x3c   :  { %v608_v29 = vld [vmem:[%s1196_s2] ss:$0 sm:$0xff]  ;;  %v306_v37 = vld [vmem:[#allocation4 + $0x18] sm:$0xff]  ;;  %v308_v40 = vld [vmem:[#allocation4 + $0x28] sm:$0xff]  ;;  %v968_v22 = vmov 1326507024  }
  0x3d   :  { %781 = vmatpush3.bf16.msra.mxu0 %v780_v8  ;;  %v303_v33 = vld [vmem:[#allocation4] sm:$0xff]  ;;  %v804_v38 = vpack.c.bf16 %v306_v37, %v305_v35  ;;  %v309_v42 = vld [vmem:[#allocation4 + $0x30] sm:$0xff]  ;;  %v310_v43 = vld [vmem:[#allocation4 + $0x38] sm:$0xff]  ;;  %v963_v8 = vmov 683565275  }
  0x3e   :  { %782 = vmatprep.subr.bf16.mxu0 %v960_v1  ;;  %v801_v36 = vpack.c.bf16 %v304_v34, %v303_v33  ;;  %v307_v39 = vld [vmem:[#allocation4 + $0x20] sm:$0xff]  ;;  %v810_v44 = vpack.c.bf16 %v310_v43, %v309_v42  ;;  %v312_v46 = vld [vmem:[#allocation4 + $0x48] sm:$0xff]  ;;  %v313_v48 = vld [vmem:[#allocation4 + $0x50] sm:$0xff] }
  0x3f   :  { %v807_v41 = vpack.c.bf16 %v308_v40, %v307_v39  ;;  %v311_v45 = vld [vmem:[#allocation4 + $0x40] sm:$0xff]  ;;  %v314_v49 = vld [vmem:[#allocation4 + $0x58] sm:$0xff]  ;;  %v316_v52 = vld [vmem:[#allocation4 + $0x68] sm:$0xff] }
  0x40   :  { %802 = vmatpush3.bf16.msra.mxu1 %v801_v36  ;;  %v813_v47 = vpack.c.bf16 %v312_v46, %v311_v45  ;;  %v816_v50 = vpack.c.bf16 %v314_v49, %v313_v48  ;;  %v315_v51 = vld [vmem:[#allocation4 + $0x60] sm:$0xff]  ;;  %v317_v54 = vld [vmem:[#allocation4 + $0x70] sm:$0xff]  ;;  %v318_v55 = vld [vmem:[#allocation4 + $0x78] sm:$0xff] }
  0x41   :  { %784 = vmatpush3.bf16.msra.mxu0 %v783_v12  ;;  %803 = vmatprep.subr.bf16.mxu1 %v960_v1  ;;  %v819_v53 = vpack.c.bf16 %v316_v52, %v315_v51  ;;  %v822_v56 = vpack.c.bf16 %v318_v55, %v317_v54  ;;  %v609_v57 = vld [vmem:[%s1198_s4] ss:$0 sm:$0xff] }
  0x42   :  { %785 = vmatprep.subr.bf16.mxu0 %v960_v1 }
  0x44   :  { %805 = vmatpush3.bf16.msra.mxu1 %v804_v38 }
  0x45   :  { %787 = vmatpush3.bf16.msra.mxu0 %v786_v15  ;;  %806 = vmatprep.subr.bf16.mxu1 %v960_v1 }
  0x46   :  { %788 = vmatprep.subr.bf16.mxu0 %v960_v1 }
  0x48   :  { %808 = vmatpush3.bf16.msra.mxu1 %v807_v41 }
  0x49   :  { %790 = vmatpush3.bf16.msra.mxu0 %v789_v18  ;;  %809 = vmatprep.subr.bf16.mxu1 %v960_v1 }
  0x4a   :  { %791 = vmatprep.subr.bf16.mxu0 %v960_v1 }
  0x4c   :  { %811 = vmatpush3.bf16.msra.mxu1 %v810_v44 }
  0x4d   :  { %793 = vmatpush3.bf16.msra.mxu0 %v792_v21  ;;  %812 = vmatprep.subr.bf16.mxu1 %v960_v1 }
  0x4e   :  { %794 = vmatprep.subr.bf16.mxu0 %v960_v1 }
  0x50   :  { %814 = vmatpush3.bf16.msra.mxu1 %v813_v47 }
  0x51   :  { %796 = vmatpush3.bf16.msra.mxu0 %v795_v24  ;;  %815 = vmatprep.subr.bf16.mxu1 %v960_v1 }
  0x52   :  { %797 = vmatprep.subr.bf16.mxu0 %v960_v1 }
  0x54   :  { %817 = vmatpush3.bf16.msra.mxu1 %v816_v50 }
  0x55   :  { %799 = vmatpush3.bf16.msra.mxu0 %v798_v27  ;;  %818 = vmatprep.subr.bf16.mxu1 %v960_v1 }
  0x56   :  { %824 = vmatprep.subr.bf16.mxu0 %v960_v1 }
  0x58   :  { %820 = vmatpush3.bf16.msra.mxu1 %v819_v53 }
  0x59   :  { %821 = vmatprep.subr.bf16.mxu1 %v960_v1 }
  0x5c   :  { %823 = vmatpush3.bf16.msra.mxu1 %v822_v56 }
  0xb6   :  { %v78_v30 = vpop.permute.xlu0 %77 }
  0xb7   :  { %v86_v31 = vmul.f32 %v607_v28, %v78_v30 }
  0xb9   :  { %v94_v32 = vadd.f32 %v608_v29, %v86_v31 }
  0xbb   :  { %704 = vmatmul.mubr.f32.vlgmr.msra.gmra.mrb[0].mxu0 %v94_v32 }
  0xbc   :  { %773 = vmatprep.mubr.msk.f32.mxu0 %vm961_vm0, %v962_v11 }
 0x18e   :  { %v187_v58 = vpop.f32.mrb[0].mxu0 }
 0x18f   :  { %v1103_v59 = vadd.f32 %v609_v57, %v187_v58  ;;  %v705_v60 = vpop.f32.mrb[1].mxu0 }
 0x191   :  { %v194_v61 = vand.u32 2139095040, %v1103_v59  ;;  %v191_v2 = vand.u32 2147483647, %v1103_v59  ;;  %vm193_vm8 = vcmp.lt.s32.totalorder %v1103_v59, 0  ;;  %vm283_vm14 = vweird.f32 %v1103_v59 }
 0x193   :  { %v195_v62 = vshrl.u32 %v194_v61, 23  ;;  %v198_v6 = vand.u32 8388607, %v191_v2  ;;  %vm192_vm9 = vcmp.le.f32.partialorder %v191_v2, 0.7853982 }
 0x195   :  { %v610_v63 = vadd.s32 4294967169, %v195_v62  ;;  %v199_v24 = vor.u32 8388608, %v198_v6 }
 0x197   :  { %v201_v0 = vadd.s32 1, %v610_v63  ;;  %v239_v38 = vshll.u32 %v199_v24, 8 }
 0x199   :  { %vm202_vm1 = vcmp.gt.s32.totalorder %v201_v0, 0 }
 0x19a   :  { %v203_v3 = vsel %vm202_vm1, %v201_v0, 0 }
 0x19b   :  { %v205_v4 = vand.u32 31, %v203_v3  ;;  %v204_v7 = vshrl.u32 %v203_v3, 5 }
 0x19d   :  { %v206_v5 = vsub.s32 32, %v205_v4  ;;  %v208_v9 = vshll.u32 %v963_v8, %v205_v4  ;;  %v211_v11 = vshll.u32 %v964_v10, %v205_v4  ;;  %v214_v15 = vshll.u32 %v965_v13, %v205_v4 }
 0x19e   :  { %v217_v18 = vshll.u32 %v966_v16, %v205_v4  ;;  %v220_v21 = vshll.u32 %v967_v19, %v205_v4  ;;  %vm223_vm2 = vcmp.lt.s32.totalorder %v204_v7, 1  ;;  %vm226_vm3 = vcmp.lt.s32.totalorder %v204_v7, 4 }
 0x19f   :  { %v209_v12 = vshrl.u32 %v964_v10, %v206_v5  ;;  %v212_v14 = vshrl.u32 %v965_v13, %v206_v5  ;;  %v215_v17 = vshrl.u32 %v966_v16, %v206_v5  ;;  %v218_v20 = vshrl.u32 %v967_v19, %v206_v5 }
 0x1a0   :  { %v221_v23 = vshrl.u32 %v968_v22, %v206_v5  ;;  %v207_v33 = vshrl.u32 %v963_v8, %v206_v5  ;;  %vm225_vm4 = vcmp.lt.s32.totalorder %v204_v7, 3  ;;  %vm224_vm5 = vcmp.lt.s32.totalorder %v204_v7, 2 }
 0x1a1   :  { %v210_v25 = vor.u32 %v209_v12, %v208_v9  ;;  %v213_v26 = vor.u32 %v212_v14, %v211_v11  ;;  %v216_v27 = vor.u32 %v215_v17, %v214_v15  ;;  %v219_v28 = vor.u32 %v218_v20, %v217_v18 }
 0x1a2   :  { %v222_v29 = vor.u32 %v221_v23, %v220_v21  ;;  %v296_v17 = vmul.f32 0.70710677, %v1103_v59 }
 0x1a3   :  { %v228_v30 = vsel %vm226_vm3, %v216_v27, 2102212464  ;;  %v231_v31 = vsel %vm223_vm2, %v210_v25, %v213_v26  ;;  %v235_v32 = vsel %vm223_vm2, %v213_v26, %v216_v27  ;;  %v232_v34 = vsel %vm226_vm3, %v219_v28, 920167782 }
 0x1a4   :  { %v236_v35 = vsel %vm226_vm3, %v222_v29, 1326507024  ;;  %v233_v36 = vsel %vm225_vm4, %v216_v27, %v232_v34  ;;  %v227_v39 = vsel %vm223_vm2, %v207_v33, %v210_v25  ;;  %v229_v40 = vsel %vm225_vm4, %v213_v26, %v228_v30 }
 0x1a5   :  { %v237_v37 = vsel %vm225_vm4, %v219_v28, %v236_v35  ;;  %v234_v41 = vsel %vm224_vm5, %v231_v31, %v233_v36  ;;  %v230_v47 = vsel %vm224_vm5, %v227_v39, %v229_v40  ;;  %872 = verf.f32 %v296_v17 }
 0x1a6   :  { %v238_v42 = vsel %vm224_vm5, %v235_v32, %v237_v37  ;;  %v1123_v45 = vmul.u32.u64.low %v239_v38, %v234_v41  ;;  %v1124_v46 = vmul.u32.u64.high %v239_v38, %v234_v41, %v1123_v45  ;;  %v246_v49 = vmul.u32 %v239_v38, %v230_v47  ;;  %v506_v41 = vld [vmem:[#allocation6] sm:$0xff] }
 0x1a7   :  { %v1120_v43 = vmul.u32.u64.low %v239_v38, %v238_v42  ;;  %v1121_v44 = vmul.u32.u64.high %v239_v38, %v238_v42, %v1120_v43  ;;  %v95_v26 = vlaneseq  ;;  %v295_v35 = vmul.f32 0.5, %v1103_v59  ;;  %v507_v42 = vld [vmem:[#allocation6 + $0x8] sm:$0xff]  ;;  %v510_v47 = vld [vmem:[#allocation6 + $0x20] sm:$0xff] }
 0x1a8   :  { %v249_v48 = vadd.s32 1, %v1124_v46  ;;  %v508_v43 = vld [vmem:[#allocation6 + $0x10] sm:$0xff] }
 0x1a9   :  { %vm248_vm6 = vc.u32 %v1121_v44, %v1123_v45  ;;  %v247_v62 = vadd.s32 %v1123_v45, %v1121_v44  ;;  %v1135_v30 = vand.u32 127, %v95_v26  ;;  %v825_v44 = vpack.c.bf16 %v507_v42, %v506_v41  ;;  %v509_v45 = vld [vmem:[#allocation6 + $0x18] sm:$0xff] }
 0x1aa   :  { %v250_v50 = vsel %vm248_vm6, %v249_v48, %v1124_v46  ;;  %v828_v46 = vpack.c.bf16 %v509_v45, %v508_v43  ;;  %v511_v48 = vld [vmem:[#allocation6 + $0x28] sm:$0xff] }
 0x1ab   :  { %v251_v51 = vadd.s32 %v250_v50, %v246_v49  ;;  %vm97_vm12 = vcmp.lt.s32.totalorder %v1135_v30, 64  ;;  %826 = vmatpush3.bf16.msra.mxu0 %v825_v44  ;;  %v512_v49 = vld [vmem:[#allocation6 + $0x30] sm:$0xff]  ;;  %v513_v50 = vld [vmem:[#allocation6 + $0x38] sm:$0xff] }
 0x1ac   :  { %827 = vmatprep.subr.bf16.mxu0 %v960_v1 }
 0x1ad   :  { %v252_v52 = vadd.s32 536870912, %v251_v51 }
 0x1af   :  { %v253_v53 = vshrl.u32 %v252_v52, 30  ;;  %v873_v27 = vpop.eup %872  ;;  %829 = vmatpush3.bf16.msra.mxu0 %v828_v46  ;;  %v514_v52 = vld [vmem:[#allocation6 + $0x40] sm:$0xff] }
 0x1b0   :  { %v298_v33 = vadd.f32 1.0, %v873_v27  ;;  %830 = vmatprep.subr.bf16.mxu0 %v960_v1 }
 0x1b1   :  { %v254_v54 = vshll.u32 %v253_v53, 30  ;;  %v277_v15 = vsub.s32 4, %v253_v53 }
 0x1b2   :  { %v299_v38 = vmul.f32 %v298_v33, %v295_v35 }
 0x1b3   :  { %v255_v55 = vsub.s32 %v251_v51, %v254_v54  ;;  %v278_v21 = vsel %vm193_vm8, %v277_v15, %v253_v53  ;;  %v834_v51 = vpack.c.bf16 %v513_v50, %v512_v49  ;;  %v515_v53 = vld [vmem:[#allocation6 + $0x48] sm:$0xff] }
 0x1b4   :  { %v280_v24 = vsel %vm192_vm9, 0, %v278_v21  ;;  %v837_v54 = vpack.c.bf16 %v515_v53, %v514_v52 }
 0x1b5   :  { %v257_v56 = vsub.s32 0, %v255_v55  ;;  %v284_v25 = vadd.s32 3, %v280_v24 }
 0x1b7   :  { %v611_v57 = vmin.u32 %v257_v56, %v255_v55  ;;  %v285_v28 = vand.u32 3, %v284_v25  ;;  %v517_v56 = vld [vmem:[#allocation6 + $0x58] sm:$0xff] }
 0x1b9   :  { %v259_v58 = vclz %v611_v57  ;;  %vm290_vm10 = vcmp.eq.s32.totalorder %v285_v28, 2  ;;  %vm287_vm11 = vcmp.eq.s32.totalorder %v285_v28, 0  ;;  %vm286_vm13 = vcmp.lt.s32.totalorder %v285_v28, 2 }
 0x1bb   :  { %v612_v60 = vadd.s32 4294967294, %v259_v58  ;;  %v518_v58 = vld [vmem:[#allocation6 + $0x60] sm:$0xff] }
 0x1bd   :  { %vm613_vm7 = vcmp.lt.s32.totalorder %v612_v60, 0 }
 0x1be   :  { %v262_v61 = vsel %vm613_vm7, 0, %v612_v60  ;;  %v519_v60 = vld [vmem:[#allocation6 + $0x68] sm:$0xff] }
 0x1bf   :  { %v263_v63 = vsub.s32 32, %v262_v61  ;;  %v267_v0 = vsub.s32 4294967266, %v262_v61  ;;  %v264_v3 = vshll.u32 %v255_v55, %v262_v61  ;;  %v516_v55 = vld [vmem:[#allocation6 + $0x50] sm:$0xff]  ;;  %v843_v61 = vpack.c.bf16 %v519_v60, %v518_v58 }
 0x1c0   :  { %v840_v57 = vpack.c.bf16 %v517_v56, %v516_v55 }
 0x1c1   :  { %v265_v4 = vshrl.u32 %v247_v62, %v263_v63  ;;  %v268_v5 = vadd.s32 127, %v267_v0  ;;  %v520_v62 = vld [vmem:[#allocation6 + $0x70] sm:$0xff]  ;;  %v521_v63 = vld [vmem:[#allocation6 + $0x78] sm:$0xff] }
 0x1c2   :  { %v846_v0 = vpack.c.bf16 %v521_v63, %v520_v62 }
 0x1c3   :  { %v266_v6 = vor.u32 %v265_v4, %v264_v3  ;;  %v269_v7 = vshll.u32 %v268_v5, 23  ;;  %v614_v3 = vld [vmem:[%s1200_s6] ss:$0 sm:$0xff] }
 0x1c5   :  { %v270_v9 = vor.u32 4788187, %v269_v7  ;;  %v273_v12 = vcvt.s32.f32 %v266_v6 }
 0x1c7   :  { %v271_v11 = vand.u32 2147483647, %v270_v9 }
 0x1c9   :  { %v274_v14 = vmul.f32 %v273_v12, %v271_v11 }
 0x1cb   :  { %v275_v18 = vxor.u32 2147483648, %v274_v14 }
 0x1cd   :  { %v276_v20 = vsel %vm193_vm8, %v275_v18, %v274_v14 }
 0x1ce   :  { %v279_v23 = vsel %vm192_vm9, %v1103_v59, %v276_v20  ;;  %v831_v59 = vpack.c.bf16 %v511_v48, %v510_v47 }
 0x1cf   :  { %874 = vcosq.f32 %v279_v23 }
 0x1d0   :  { %876 = vsinq.f32 %v279_v23  ;;  %832 = vmatpush3.bf16.msra.mxu0 %v831_v59 }
 0x1d1   :  { %833 = vmatprep.subr.bf16.mxu0 %v960_v1 }
 0x1d4   :  { %835 = vmatpush3.bf16.msra.mxu0 %v834_v51 }
 0x1d5   :  { %836 = vmatprep.subr.bf16.mxu0 %v960_v1 }
 0x1d8   :  { %838 = vmatpush3.bf16.msra.mxu0 %v837_v54 }
 0x1d9   :  { %v875_v29 = vpop.eup %874  ;;  %839 = vmatprep.subr.bf16.mxu0 %v960_v1 }
 0x1da   :  { %v877_v31 = vpop.eup %876  ;;  %v291_v32 = vxor.u32 2147483648, %v875_v29 }
 0x1db   :  { %v288_v34 = vxor.u32 2147483648, %v877_v31 }
 0x1dc   :  { %v292_v2 = vsel %vm290_vm10, %v291_v32, %v877_v31  ;;  %841 = vmatpush3.bf16.msra.mxu0 %v840_v57 }
 0x1dd   :  { %v289_v36 = vsel %vm287_vm11, %v875_v29, %v288_v34  ;;  %842 = vmatprep.subr.bf16.mxu0 %v960_v1 }
 0x1de   :  { %v293_v37 = vsel %vm286_vm13, %v289_v36, %v292_v2  ;;  %vm599_vm13 = vcmask 7168  }
 0x1df   :  { %v294_v39 = vsel %vm283_vm14, nan, %v293_v37 }
 0x1e0   :  { %v302_v40 = vsel %vm97_vm12, %v294_v39, %v299_v38  ;;  %844 = vmatpush3.bf16.msra.mxu0 %v843_v61 }
 0x1e1   :  { %739 = vmatmul.mubr.f32.vlgmr.msra.gmra.mrb[0].mxu1 %v302_v40  ;;  %845 = vmatprep.subr.bf16.mxu0 %v960_v1 }
 0x1e4   :  { %847 = vmatpush3.bf16.msra.mxu0 %v846_v0 }
 0x2b4   :  { %v392_v4 = vpop.f32.mrb[0].mxu1 }
 0x2b5   :  { %v1152_v5 = vadd.f32 %v614_v3, %v392_v4  ;;  %v740_v6 = vpop.f32.mrb[1].mxu1 }
 0x2b7   :  { %v399_v7 = vand.u32 2139095040, %v1152_v5  ;;  %v396_v14 = vand.u32 2147483647, %v1152_v5  ;;  %vm398_vm6 = vcmp.lt.s32.totalorder %v1152_v5, 0  ;;  %vm488_vm11 = vweird.f32 %v1152_v5 }
 0x2b9   :  { %v400_v9 = vshrl.u32 %v399_v7, 23  ;;  %v403_v18 = vand.u32 8388607, %v396_v14  ;;  %vm397_vm7 = vcmp.le.f32.partialorder %v396_v14, 0.7853982  ;;  %v500_v14 = vmul.f32 0.5, %v1152_v5 }
 0x2bb   :  { %v615_v11 = vadd.s32 4294967169, %v400_v9  ;;  %v404_v33 = vor.u32 8388608, %v403_v18 }
 0x2bd   :  { %v406_v12 = vadd.s32 1, %v615_v11 }
 0x2bf   :  { %vm407_vm15 = vcmp.gt.s32.totalorder %v406_v12, 0 }
 0x2c0   :  { %v408_v15 = vsel %vm407_vm15, %v406_v12, 0 }
 0x2c1   :  { %v410_v17 = vand.u32 31, %v408_v15  ;;  %v409_v20 = vshrl.u32 %v408_v15, 5 }
 0x2c3   :  { %v411_v1 = vsub.s32 32, %v410_v17  ;;  %v413_v21 = vshll.u32 %v963_v8, %v410_v17  ;;  %v416_v23 = vshll.u32 %v964_v10, %v410_v17  ;;  %v419_v26 = vshll.u32 %v965_v13, %v410_v17 }
 0x2c4   :  { %v422_v28 = vshll.u32 %v966_v16, %v410_v17  ;;  %v425_v31 = vshll.u32 %v967_v19, %v410_v17  ;;  %vm428_vm0 = vcmp.lt.s32.totalorder %v409_v20, 1  ;;  %vm431_vm1 = vcmp.lt.s32.totalorder %v409_v20, 4 }
 0x2c5   :  { %v414_v24 = vshrl.u32 %v964_v10, %v411_v1  ;;  %v417_v25 = vshrl.u32 %v965_v13, %v411_v1  ;;  %v420_v27 = vshrl.u32 %v966_v16, %v411_v1  ;;  %v423_v29 = vshrl.u32 %v967_v19, %v411_v1 }
 0x2c6   :  { %v426_v32 = vshrl.u32 %v968_v22, %v411_v1  ;;  %v412_v39 = vshrl.u32 %v963_v8, %v411_v1  ;;  %vm430_vm2 = vcmp.lt.s32.totalorder %v409_v20, 3  ;;  %vm429_vm3 = vcmp.lt.s32.totalorder %v409_v20, 2 }
 0x2c7   :  { %v415_v34 = vor.u32 %v414_v24, %v413_v21  ;;  %v418_v2 = vor.u32 %v417_v25, %v416_v23  ;;  %v421_v35 = vor.u32 %v420_v27, %v419_v26  ;;  %v424_v36 = vor.u32 %v423_v29, %v422_v28 }
 0x2c8   :  { %v427_v10 = vor.u32 %v426_v32, %v425_v31  ;;  %v444_v22 = vshll.u32 %v404_v33, 8  ;;  %v501_v20 = vmul.f32 0.70710677, %v1152_v5 }
 0x2c9   :  { %v433_v37 = vsel %vm431_vm1, %v421_v35, 2102212464  ;;  %v436_v13 = vsel %vm428_vm0, %v415_v34, %v418_v2  ;;  %v440_v38 = vsel %vm428_vm0, %v418_v2, %v421_v35  ;;  %v437_v16 = vsel %vm431_vm1, %v424_v36, 920167782 }
 0x2ca   :  { %v441_v40 = vsel %vm431_vm1, %v427_v10, 1326507024  ;;  %v438_v19 = vsel %vm430_vm2, %v421_v35, %v437_v16  ;;  %v432_v42 = vsel %vm428_vm0, %v412_v39, %v415_v34  ;;  %v434_v43 = vsel %vm430_vm2, %v418_v2, %v433_v37  ;;  %v619_v39 = vld [vmem:[%s1202_s8] ss:$0 sm:$0xff] }
 0x2cb   :  { %v442_v41 = vsel %vm430_vm2, %v424_v36, %v441_v40  ;;  %v439_v44 = vsel %vm429_vm3, %v436_v13, %v438_v19  ;;  %v435_v49 = vsel %vm429_vm3, %v432_v42, %v434_v43  ;;  %878 = verf.f32 %v501_v20 }
 0x2cc   :  { %v443_v45 = vsel %vm429_vm3, %v440_v38, %v442_v41  ;;  %v1172_v48 = vmul.u32.u64.low %v444_v22, %v439_v44  ;;  %v1173_v59 = vmul.u32.u64.high %v444_v22, %v439_v44, %v1172_v48  ;;  %v451_v50 = vmul.u32 %v444_v22, %v435_v49 }
 0x2cd   :  { %v1169_v46 = vmul.u32.u64.low %v444_v22, %v443_v45  ;;  %v1170_v47 = vmul.u32.u64.high %v444_v22, %v443_v45, %v1169_v46 }
 0x2ce   :  { %v454_v8 = vadd.s32 1, %v1173_v59 }
 0x2cf   :  { %vm453_vm4 = vc.u32 %v1170_v47, %v1172_v48  ;;  %v452_v63 = vadd.s32 %v1172_v48, %v1170_v47 }
 0x2d0   :  { %v455_v51 = vsel %vm453_vm4, %v454_v8, %v1173_v59 }
 0x2d1   :  { %v456_v52 = vadd.s32 %v455_v51, %v451_v50 }
 0x2d3   :  { %v457_v53 = vadd.s32 536870912, %v456_v52 }
 0x2d5   :  { %v458_v54 = vshrl.u32 %v457_v53, 30  ;;  %v879_v28 = vpop.eup %878 }
 0x2d6   :  { %v503_v34 = vadd.f32 1.0, %v879_v28 }
 0x2d7   :  { %v459_v55 = vshll.u32 %v458_v54, 30  ;;  %v482_v18 = vsub.s32 4, %v458_v54 }
 0x2d8   :  { %v504_v37 = vmul.f32 %v503_v34, %v500_v14 }
 0x2d9   :  { %v460_v56 = vsub.s32 %v456_v52, %v459_v55  ;;  %v483_v24 = vsel %vm398_vm6, %v482_v18, %v458_v54 }
 0x2da   :  { %v485_v26 = vsel %vm397_vm7, 0, %v483_v24 }
 0x2db   :  { %v462_v57 = vsub.s32 0, %v460_v56  ;;  %v489_v27 = vadd.s32 3, %v485_v26 }
 0x2dd   :  { %v616_v58 = vmin.u32 %v462_v57, %v460_v56  ;;  %v490_v29 = vand.u32 3, %v489_v27 }
 0x2df   :  { %v464_v60 = vclz %v616_v58  ;;  %vm495_vm8 = vcmp.eq.s32.totalorder %v490_v29, 2  ;;  %vm492_vm9 = vcmp.eq.s32.totalorder %v490_v29, 0  ;;  %vm491_vm10 = vcmp.lt.s32.totalorder %v490_v29, 2 }
 0x2e1   :  { %v617_v61 = vadd.s32 4294967294, %v464_v60 }
 0x2e3   :  { %vm618_vm5 = vcmp.lt.s32.totalorder %v617_v61, 0 }
 0x2e4   :  { %v467_v62 = vsel %vm618_vm5, 0, %v617_v61 }
 0x2e5   :  { %v468_v0 = vsub.s32 32, %v467_v62  ;;  %v472_v3 = vsub.s32 4294967266, %v467_v62  ;;  %v469_v4 = vshll.u32 %v460_v56, %v467_v62 }
 0x2e7   :  { %v470_v6 = vshrl.u32 %v452_v63, %v468_v0  ;;  %v473_v7 = vadd.s32 127, %v472_v3 }
 0x2e9   :  { %v471_v9 = vor.u32 %v470_v6, %v469_v4  ;;  %v474_v11 = vshll.u32 %v473_v7, 23 }
 0x2eb   :  { %v475_v12 = vor.u32 4788187, %v474_v11  ;;  %v478_v17 = vcvt.s32.f32 %v471_v9 }
 0x2ed   :  { %v476_v15 = vand.u32 2147483647, %v475_v12 }
 0x2ef   :  { %v479_v1 = vmul.f32 %v478_v17, %v476_v15 }
 0x2f1   :  { %v480_v21 = vxor.u32 2147483648, %v479_v1 }
 0x2f3   :  { %v481_v23 = vsel %vm398_vm6, %v480_v21, %v479_v1 }
 0x2f4   :  { %v484_v25 = vsel %vm397_vm7, %v1152_v5, %v481_v23 }
 0x2f5   :  { %880 = vcosq.f32 %v484_v25 }
 0x2f6   :  { %882 = vsinq.f32 %v484_v25 }
 0x2ff   :  { %v881_v31 = vpop.eup %880 }
 0x300   :  { %v883_v32 = vpop.eup %882  ;;  %v496_v33 = vxor.u32 2147483648, %v881_v31 }
 0x301   :  { %v493_v2 = vxor.u32 2147483648, %v883_v32 }
 0x302   :  { %v497_v35 = vsel %vm495_vm8, %v496_v33, %v883_v32 }
 0x303   :  { %v494_v36 = vsel %vm492_vm9, %v881_v31, %v493_v2 }
 0x304   :  { %v498_v10 = vsel %vm491_vm10, %v494_v36, %v497_v35 }
 0x305   :  { %v499_v13 = vsel %vm488_vm11, nan, %v498_v10 }
 0x306   :  { %v505_v38 = vsel %vm97_vm12, %v499_v13, %v504_v37 }
 0x307   :  { %774 = vmatmul.mubr.f32.vlgmr.msra.gmra.mrb[2].mxu0 %v505_v38 }
 0x3da   :  { %v595_v16 = vpop.f32.mrb[2].mxu0 }
 0x3db   :  { %v596_v40 = vadd.f32 %v619_v39, %v595_v16  ;;  %v775_v19 = vpop.f32.mrb[3].mxu0 }
 0x3dd   :  { %600 = vst.msk [vmem:[%s1203_s9] sm:$0xff] %vm599_vm13, %v596_v40 }
 0x3de   :  { %605 = vsyncpa [#allocation3], 1 }
 0x3df   :  { %606 = vsyncpa [#allocation5], 1 }

</bundles_post_ra>
